<compile_context>
chip_gen: v6e
topology: v6e:2x2x1
jax: 0.10.0
libtpu: 0.0.40
codegen_flags: <defaults>
</compile_context>

<pallas_src>
import jax
import jax.numpy as jnp
from jax.experimental import pallas as pl
from jax.experimental.pallas import tpu as pltpu


def complex_linear_kernel(xr_ref, xi_ref, wr_ref, wi_ref, br_ref, bi_ref,
                          or_ref, oi_ref):
    # xr/xi: (tm, K)  wr/wi: (K, N)  br/bi: (1, N)  or/oi: (tm, N)
    xr = xr_ref[...]
    xi = xi_ref[...]
    wr = wr_ref[...]
    wi = wi_ref[...]

    # Four MXU pushes, all accumulated in f32.
    rr = jnp.dot(xr, wr, preferred_element_type=jnp.float32)
    ii = jnp.dot(xi, wi, preferred_element_type=jnp.float32)
    ri = jnp.dot(xr, wi, preferred_element_type=jnp.float32)
    ir = jnp.dot(xi, wr, preferred_element_type=jnp.float32)

    br = br_ref[...].astype(jnp.float32)
    bi = bi_ref[...].astype(jnp.float32)

    # out_r = fc_r(x_r) - fc_i(x_i) ; out_i = fc_r(x_i) + fc_i(x_r)
    or_ref[...] = (rr - ii + (br - bi)).astype(or_ref.dtype)
    oi_ref[...] = (ir + ri + (br + bi)).astype(oi_ref.dtype)


def complex_linear(x_r, x_i, w_r, w_i, b_r, b_i, *, tm=256):
    """ComplexLinear forward.

    x_r, x_i : (B, K)  activations
    w_r, w_i : (K, N)  fc_r / fc_i weights, stored transposed (W^T)
    b_r, b_i : (N,)    fc_r / fc_i biases
    Returns (out_r, out_i), each (B, N).
    """
    B, K = x_r.shape
    N = w_r.shape[1]
    dt = x_r.dtype

    # Whole batch as one tile when it fits; otherwise tm-row blocks.  A ragged
    # last block is handled by pl.cdiv + Pallas' masked partial stores.
    row_tile = min(tm, B)
    grid = (pl.cdiv(B, row_tile),)

    # Lane-dense (1, N) bias rows (metadata-only reshape, no copy of note).
    b_r2 = b_r.reshape(1, N)
    b_i2 = b_i.reshape(1, N)

    act_spec = pl.BlockSpec((row_tile, K), lambda i: (i, 0))
    # Constant index maps -> weight / bias blocks stay resident in VMEM across
    # grid steps (no per-step re-DMA).
    w_spec = pl.BlockSpec((K, N), lambda i: (0, 0))
    b_spec = pl.BlockSpec((1, N), lambda i: (0, 0))
    out_spec = pl.BlockSpec((row_tile, N), lambda i: (i, 0))

    out_r, out_i = pl.pallas_call(
        complex_linear_kernel,
        out_shape=(jax.ShapeDtypeStruct((B, N), dt),
                   jax.ShapeDtypeStruct((B, N), dt)),
        grid_spec=pl.GridSpec(
            grid=grid,
            in_specs=[act_spec, act_spec, w_spec, w_spec, b_spec, b_spec],
            out_specs=(out_spec, out_spec),
        ),
        compiler_params=pltpu.CompilerParams(
            # Independent row tiles -> megacore sharding on v7x when the grid
            # has >= 2 steps; harmless no-op on v5e/v6e.
            dimension_semantics=("parallel",),
        ),
    )(x_r, x_i, w_r, w_i, b_r2, b_i2)
    return out_r, out_i


if __name__ == "__main__":
    key = jax.random.PRNGKey(0)
    k_xr, k_xi, k_wr, k_wi, k_br, k_bi, k_xr2, k_xi2 = jax.random.split(key, 8)

    # Shapes consistent with the module: ComplexLinear(q_dim, q_dim), q_dim=32.
    B, K, N = 16, 32, 32

    x_r = jax.random.normal(k_xr, (B, K), dtype=jnp.float32)
    x_i = jax.random.normal(k_xi, (B, K), dtype=jnp.float32)

    # nn.Linear-like init scale; weights stored as (K, N) = W^T.
    scale = 1.0 / jnp.sqrt(jnp.float32(K))
    w_r = jax.random.uniform(k_wr, (K, N), dtype=jnp.float32, minval=-scale, maxval=scale)
    w_i = jax.random.uniform(k_wi, (K, N), dtype=jnp.float32, minval=-scale, maxval=scale)
    b_r = jax.random.uniform(k_br, (N,), dtype=jnp.float32, minval=-scale, maxval=scale)
    b_i = jax.random.uniform(k_bi, (N,), dtype=jnp.float32, minval=-scale, maxval=scale)

    def ref(xr, xi):
        return ((xr @ w_r + b_r) - (xi @ w_i + b_i),
                (xi @ w_r + b_r) + (xr @ w_i + b_i))

    # Exact single-block case.
    out_r, out_i = complex_linear(x_r, x_i, w_r, w_i, b_r, b_i)
    jax.block_until_ready((out_r, out_i))
    ref_r, ref_i = ref(x_r, x_i)
    assert out_r.shape == (B, N) and out_i.shape == (B, N)
    assert jnp.allclose(out_r, ref_r, atol=1e-5, rtol=1e-5)
    assert jnp.allclose(out_i, ref_i, atol=1e-5, rtol=1e-5)

    # Ragged-batch case: B not a multiple of the row tile -> 2 grid steps with
    # a masked partial last block (exercises the path flagged in review).
    B2 = 200
    x_r2 = jax.random.normal(k_xr2, (B2, K), dtype=jnp.float32)
    x_i2 = jax.random.normal(k_xi2, (B2, K), dtype=jnp.float32)
    out_r2, out_i2 = complex_linear(x_r2, x_i2, w_r, w_i, b_r, b_i, tm=128)
    jax.block_until_ready((out_r2, out_i2))
    ref_r2, ref_i2 = ref(x_r2, x_i2)
    assert jnp.allclose(out_r2, ref_r2, atol=1e-5, rtol=1e-5)
    assert jnp.allclose(out_i2, ref_i2, atol=1e-5, rtol=1e-5)

    print("KERNEL_OK")
</pallas_src>

<mosaic_0001>
module attributes {stable_mosaic.version = 11 : i64} {
  func.func @complex_linear_kernel(%arg0: i32, %arg1: memref<16x32xf32, #tpu.memory_space<vmem>>, %arg2: memref<16x32xf32, #tpu.memory_space<vmem>>, %arg3: memref<32x32xf32, #tpu.memory_space<vmem>>, %arg4: memref<32x32xf32, #tpu.memory_space<vmem>>, %arg5: memref<1x32xf32, #tpu.memory_space<vmem>>, %arg6: memref<1x32xf32, #tpu.memory_space<vmem>>, %arg7: memref<16x32xf32, #tpu.memory_space<vmem>>, %arg8: memref<16x32xf32, #tpu.memory_space<vmem>>) attributes {dimension_semantics = [#tpu.dimension_semantics<parallel>], iteration_bounds = array<i64: 1>, scalar_prefetch = 0 : i64, scratch_operands = 0 : i64, tpu.core_type = #tpu.core_type<tc>, window_params = [{transform_indices = @transform_0, window_bounds = array<i64: 16, 32>}, {transform_indices = @transform_1, window_bounds = array<i64: 16, 32>}, {pipeline_mode = #tpu.pipeline_mode<synchronous>, transform_indices = @transform_2, window_bounds = array<i64: 32, 32>}, {pipeline_mode = #tpu.pipeline_mode<synchronous>, transform_indices = @transform_3, window_bounds = array<i64: 32, 32>}, {pipeline_mode = #tpu.pipeline_mode<synchronous>, transform_indices = @transform_4, window_bounds = array<i64: 1, 32>}, {pipeline_mode = #tpu.pipeline_mode<synchronous>, transform_indices = @transform_5, window_bounds = array<i64: 1, 32>}, {transform_indices = @transform_6, window_bounds = array<i64: 16, 32>}, {transform_indices = @transform_7, window_bounds = array<i64: 16, 32>}]} {
    %c0 = arith.constant 0 : index
    %c0_0 = arith.constant 0 : index
    %0 = vector.load %arg1[%c0, %c0_0] : memref<16x32xf32, #tpu.memory_space<vmem>>, vector<16x32xf32>
    %c0_1 = arith.constant 0 : index
    %c0_2 = arith.constant 0 : index
    %1 = vector.load %arg2[%c0_1, %c0_2] : memref<16x32xf32, #tpu.memory_space<vmem>>, vector<16x32xf32>
    %c0_3 = arith.constant 0 : index
    %c0_4 = arith.constant 0 : index
    %2 = vector.load %arg3[%c0_3, %c0_4] : memref<32x32xf32, #tpu.memory_space<vmem>>, vector<32x32xf32>
    %c0_5 = arith.constant 0 : index
    %c0_6 = arith.constant 0 : index
    %3 = vector.load %arg4[%c0_5, %c0_6] : memref<32x32xf32, #tpu.memory_space<vmem>>, vector<32x32xf32>
    %cst = arith.constant dense<0.000000e+00> : vector<16x32xf32>
    %4 = tpu.matmul %0, %2, %cst {dimension_numbers = #tpu.dot_dimension_numbers<[1], [0], [0], [1], [0, 0, 1, 1], [], []>} : vector<16x32xf32>, vector<32x32xf32>, vector<16x32xf32> -> vector<16x32xf32>
    %cst_7 = arith.constant dense<0.000000e+00> : vector<16x32xf32>
    %5 = tpu.matmul %1, %3, %cst_7 {dimension_numbers = #tpu.dot_dimension_numbers<[1], [0], [0], [1], [0, 0, 1, 1], [], []>} : vector<16x32xf32>, vector<32x32xf32>, vector<16x32xf32> -> vector<16x32xf32>
    %cst_8 = arith.constant dense<0.000000e+00> : vector<16x32xf32>
    %6 = tpu.matmul %0, %3, %cst_8 {dimension_numbers = #tpu.dot_dimension_numbers<[1], [0], [0], [1], [0, 0, 1, 1], [], []>} : vector<16x32xf32>, vector<32x32xf32>, vector<16x32xf32> -> vector<16x32xf32>
    %cst_9 = arith.constant dense<0.000000e+00> : vector<16x32xf32>
    %7 = tpu.matmul %1, %2, %cst_9 {dimension_numbers = #tpu.dot_dimension_numbers<[1], [0], [0], [1], [0, 0, 1, 1], [], []>} : vector<16x32xf32>, vector<32x32xf32>, vector<16x32xf32> -> vector<16x32xf32>
    %c0_10 = arith.constant 0 : index
    %c0_11 = arith.constant 0 : index
    %8 = vector.load %arg5[%c0_10, %c0_11] : memref<1x32xf32, #tpu.memory_space<vmem>>, vector<1x32xf32>
    %c0_12 = arith.constant 0 : index
    %c0_13 = arith.constant 0 : index
    %9 = vector.load %arg6[%c0_12, %c0_13] : memref<1x32xf32, #tpu.memory_space<vmem>>, vector<1x32xf32>
    %10 = arith.subf %4, %5 : vector<16x32xf32>
    %11 = arith.subf %8, %9 : vector<1x32xf32>
    %12 = vector.broadcast %11 : vector<1x32xf32> to vector<16x32xf32>
    %13 = arith.addf %10, %12 : vector<16x32xf32>
    %c0_14 = arith.constant 0 : index
    %c0_15 = arith.constant 0 : index
    %14 = vector.load %arg7[%c0_14, %c0_15] : memref<16x32xf32, #tpu.memory_space<vmem>>, vector<16x32xf32>
    tpu.vector_store %arg7[%c0_14, %c0_15], %13 {strides = array<i32>} : memref<16x32xf32, #tpu.memory_space<vmem>>, vector<16x32xf32>,
    %15 = arith.addf %7, %6 : vector<16x32xf32>
    %16 = arith.addf %8, %9 : vector<1x32xf32>
    %17 = vector.broadcast %16 : vector<1x32xf32> to vector<16x32xf32>
    %18 = arith.addf %15, %17 : vector<16x32xf32>
    %c0_16 = arith.constant 0 : index
    %c0_17 = arith.constant 0 : index
    %19 = vector.load %arg8[%c0_16, %c0_17] : memref<16x32xf32, #tpu.memory_space<vmem>>, vector<16x32xf32>
    tpu.vector_store %arg8[%c0_16, %c0_17], %18 {strides = array<i32>} : memref<16x32xf32, #tpu.memory_space<vmem>>, vector<16x32xf32>,
    return
  }
  func.func @transform_0(%arg0: i32) -> (i32, i32) {
    %c0_i32 = arith.constant 0 : i32
    %c0_i32_0 = arith.constant 0 : i32
    return %arg0, %c0_i32 : i32, i32
  }
  func.func @transform_1(%arg0: i32) -> (i32, i32) {
    %c0_i32 = arith.constant 0 : i32
    %c0_i32_0 = arith.constant 0 : i32
    return %arg0, %c0_i32 : i32, i32
  }
  func.func @transform_2(%arg0: i32) -> (i32, i32) {
    %c0_i32 = arith.constant 0 : i32
    %c0_i32_0 = arith.constant 0 : i32
    %c0_i32_1 = arith.constant 0 : i32
    return %c0_i32, %c0_i32_0 : i32, i32
  }
  func.func @transform_3(%arg0: i32) -> (i32, i32) {
    %c0_i32 = arith.constant 0 : i32
    %c0_i32_0 = arith.constant 0 : i32
    %c0_i32_1 = arith.constant 0 : i32
    return %c0_i32, %c0_i32_0 : i32, i32
  }
  func.func @transform_4(%arg0: i32) -> (i32, i32) {
    %c0_i32 = arith.constant 0 : i32
    %c0_i32_0 = arith.constant 0 : i32
    %c0_i32_1 = arith.constant 0 : i32
    return %c0_i32, %c0_i32_0 : i32, i32
  }
  func.func @transform_5(%arg0: i32) -> (i32, i32) {
    %c0_i32 = arith.constant 0 : i32
    %c0_i32_0 = arith.constant 0 : i32
    %c0_i32_1 = arith.constant 0 : i32
    return %c0_i32, %c0_i32_0 : i32, i32
  }
  func.func @transform_6(%arg0: i32) -> (i32, i32) {
    %c0_i32 = arith.constant 0 : i32
    %c0_i32_0 = arith.constant 0 : i32
    return %arg0, %c0_i32 : i32, i32
  }
  func.func @transform_7(%arg0: i32) -> (i32, i32) {
    %c0_i32 = arith.constant 0 : i32
    %c0_i32_0 = arith.constant 0 : i32
    return %arg0, %c0_i32 : i32, i32
  }
}

</mosaic_0001>

<bundles_post_ra>
// kernel: tpu_custom_call.1
= control target key start
LH: loop header
LB: loop body
LE: loop exit
PB: predicated region body
PF: predicated region fallthrough
CT: control target
= control target key end

     0   :  { %13 = vsyncpa [#allocation3], 0  ;;  %s784_s0 = inlined_call_operand.hbm [shape: f32[16,32], index: 0, kind: input, shape index: {}]   ;;  %s785_s1 = inlined_call_operand.hbm [shape: f32[16,32], index: 1, kind: input, shape index: {}]   ;;  %s786_s2 = inlined_call_operand.hbm [shape: f32[32,32], index: 2, kind: input, shape index: {}]   ;;  %s787_s3 = inlined_call_operand.hbm [shape: f32[32,32], index: 3, kind: input, shape index: {}]   ;;  %s788_s4 = inlined_call_operand.vmem [shape: f32[1,32], index: 4, kind: input, shape index: {}]   ;;  %s789_s5 = inlined_call_operand.vmem [shape: f32[1,32], index: 5, kind: input, shape index: {}]   ;;  %s790_s6 = inlined_call_operand.hbm [shape: f32[16,32], index: 6, kind: output, shape index: {0}]   ;;  %s791_s7 = inlined_call_operand.hbm [shape: f32[16,32], index: 7, kind: output, shape index: {1}]  }
   0x1   :  { %14 = vsyncpa [#allocation6], 0 }
   0x2   :  { %15 = vsyncpa [#allocation9], 0 }
   0x3   :  { %16 = vsyncpa [#allocation4], 0 }
   0x4   :  { %17 = vsyncpa [#allocation12], 0  ;;  %s682_s24 = smov [#allocation5]   ;;  %s683_s26 = smov [#allocation2]  }
   0x5   :  { %s35_s25 = sshll.u32 %s682_s24, 4  ;;  %s23_s27 = sshll.u32 %s683_s26, 4  ;;  %s36_s25 = int_to_ptr.vmem [resolvable:$true] %s35_s25  ;;  %s24_s27 = int_to_ptr.vmem [resolvable:$true] %s23_s27 }
   0x6   :  { %s560_s28 = scalar_lea.vmem %s36_s25, 256  ;;  %p565_p1 = scmp.lt.s32.totalorder %s36_s25, %s36_s25 }
   0x7   :  { %p561_p0 = scmp.ne.s32.totalorder %s36_s25, %s560_s28  ;;  %p566_p2 = scmp.lt.s32.totalorder %s560_s28, %s560_s28 }
   0x9   :  { %p567_p3 = por %p566_p2, %p565_p1 }
   0xb   :  { %p568_p4 = pnand %p567_p3, %p561_p0 }
   0xd   :  { %571 = shalt.err (!%p568_p4)
}
   0xe   :  { %s684_s29 = smov 128   ;;  %s685_s30 = smov 8  }
   0xf   :  { %41 = dma.hbm_to_vmem [thread:$0]  %s785_s1, 256, %s36_s25, [#allocation6], %s684_s29, %s684_s29, %s685_s30  }
  0x10   :  { %s580_s10 = scalar_lea.vmem %s24_s27, 256  ;;  %p585_p6 = scmp.lt.s32.totalorder %s24_s27, %s24_s27 }
  0x11   :  { %p581_p5 = scmp.ne.s32.totalorder %s24_s27, %s580_s10  ;;  %p586_p7 = scmp.lt.s32.totalorder %s580_s10, %s580_s10 }
  0x13   :  { %p587_p8 = por %p586_p7, %p585_p6 }
  0x15   :  { %p588_p9 = pnand %p587_p8, %p581_p5 }
  0x17   :  { %591 = shalt.err (!%p588_p9)
}
  0x18   :  { %29 = dma.hbm_to_vmem [thread:$0]  %s784_s0, 256, %s24_s27, [#allocation3], %s684_s29, %s684_s29, %s685_s30  }
  0x19   :  { %s686_s13 = smov [#allocation7]   ;;  %s687_s15 = smov [#allocation8]  }
  0x1a   :  { %s47_s14 = sshll.u32 %s686_s13, 4  ;;  %s59_s16 = sshll.u32 %s687_s15, 4  ;;  %s48_s14 = int_to_ptr.vmem [resolvable:$true] %s47_s14  ;;  %s60_s16 = int_to_ptr.vmem [resolvable:$true] %s59_s16 }
  0x1b   :  { %s600_s1 = scalar_lea.vmem %s48_s14, 512  ;;  %p605_p11 = scmp.lt.s32.totalorder %s48_s14, %s48_s14 }
  0x1c   :  { %p601_p10 = scmp.ne.s32.totalorder %s48_s14, %s600_s1  ;;  %p606_p12 = scmp.lt.s32.totalorder %s600_s1, %s600_s1 }
  0x1e   :  { %p607_p13 = por %p606_p12, %p605_p11 }
  0x20   :  { %p608_p0 = pnand %p607_p13, %p601_p10 }
  0x22   :  { %611 = shalt.err (!%p608_p0)
}
  0x23   :  { %53 = dma.hbm_to_vmem [thread:$0]  %s786_s2, 512, %s48_s14, [#allocation6], %s684_s29, %s684_s29, %s685_s30  }
  0x24   :  { %s620_s0 = scalar_lea.vmem %s60_s16, 512  ;;  %p625_p2 = scmp.lt.s32.totalorder %s60_s16, %s60_s16 }
  0x25   :  { %p621_p1 = scmp.ne.s32.totalorder %s60_s16, %s620_s0  ;;  %p626_p3 = scmp.lt.s32.totalorder %s620_s0, %s620_s0 }
  0x27   :  { %p627_p4 = por %p626_p3, %p625_p2 }
  0x29   :  { %p628_p5 = pnand %p627_p4, %p621_p1 }
  0x2b   :  { %631 = shalt.err (!%p628_p5)
}
  0x2c   :  { %65 = dma.hbm_to_vmem [thread:$0]  %s787_s3, 512, %s60_s16, [#allocation9], %s684_s29, %s684_s29, %s685_s30  }
  0x2d   :  { %672 = dma.done.wait [#allocation3], 256  }
  0x2e   :  { %673 = vsyncadd [#allocation3], 4294967040 }
  0x2f   :  { %674 = dma.done.wait [#allocation6], 768  }
  0x30   :  { %675 = vsyncadd [#allocation6], 4294966528 }
  0x31   :  { %676 = dma.done.wait [#allocation9], 512  }
  0x32   :  { %677 = vsyncadd [#allocation9], 4294966784  ;;  %v89_v0 = vld [vmem:[#allocation7 + $0x18] sm:$0xff]  ;;  %v88_v2 = vld [vmem:[#allocation7 + $0x10] sm:$0xff]  ;;  %vm94_vm0 = vcmask 261120   ;;  %v338_v12 = vlaneseq  ;;  %s688_s23 = smov [#allocation10]  }
  0x33   :  { %v93_v1 = vld [vmem:[#allocation8 + $0x18] sm:$0xff]  ;;  %500 = vmatprep.subr.mxu0 %v89_v0  ;;  %v92_v3 = vld [vmem:[#allocation8 + $0x10] sm:$0xff]  ;;  %v87_v4 = vld [vmem:[#allocation7 + $0x8] sm:$0xff]  ;;  %s438_s24 = sshll.u32 %s688_s23, 4  ;;  %s439_s24 = int_to_ptr.vmem [resolvable:$true] %s438_s24 }
  0x34   :  { %511 = vmatprep.subr.mxu1 %v93_v1  ;;  %501 = vmatpush3.msra.mxu0 %v89_v0  ;;  %v91_v5 = vld [vmem:[#allocation8 + $0x8] sm:$0xff]  ;;  %v86_v6 = vld [vmem:[#allocation7] sm:$0xff]  ;;  %v84_v9 = vld [vmem:[#allocation5] sm:$0xff]  ;;  %v339_v13 = vshrl.u32 %v338_v12, 7  ;;  %p637_p7 = scmp.lt.s32.totalorder %s439_s24, %s439_s24 }
  0x35   :  { %512 = vmatpush3.msra.mxu1 %v93_v1  ;;  %502 = vmatprep.subr.mxu0 %v88_v2  ;;  %v90_v7 = vld [vmem:[#allocation8] sm:$0xff]  ;;  %v83_v10 = vld [vmem:[#allocation2 + $0x8] sm:$0xff]  ;;  %v85_v11 = vld [vmem:[#allocation5 + $0x8] sm:$0xff] }
  0x36   :  { %513 = vmatprep.subr.mxu1 %v92_v3  ;;  %503 = vmatpush3.msra.mxu0 %v88_v2  ;;  %v82_v8 = vld [vmem:[#allocation2] sm:$0xff]  ;;  %v340_v17 = vsub.s32 0, %v339_v13 }
  0x37   :  { %514 = vmatpush3.msra.mxu1 %v92_v3  ;;  %504 = vmatprep.subr.mxu0 %v87_v4  ;;  %v332_v14 = vld [vmem:[%s788_s4] sm:$0x1]  ;;  %s632_s4 = scalar_lea.vmem %s439_s24, 256 }
  0x38   :  { %515 = vmatprep.subr.mxu1 %v91_v5  ;;  %505 = vmatpush3.msra.mxu0 %v87_v4  ;;  %v333_v15 = vld [vmem:[%s789_s5] sm:$0x1]  ;;  %p633_p6 = scmp.ne.s32.totalorder %s439_s24, %s632_s4  ;;  %p638_p8 = scmp.lt.s32.totalorder %s632_s4, %s632_s4 }
  0x39   :  { %516 = vmatpush3.msra.mxu1 %v91_v5  ;;  %506 = vmatprep.subr.mxu0 %v86_v6  ;;  %v336_v16 = vsub.f32 %v332_v14, %v333_v15  ;;  %v422_v27 = vadd.f32 %v333_v15, %v332_v14 }
  0x3a   :  { %517 = vmatprep.subr.mxu1 %v90_v7  ;;  %507 = vmatpush3.msra.mxu0 %v86_v6  ;;  %p639_p9 = por %p638_p8, %p637_p7 }
  0x3b   :  { %508 = vmatprep.mubr.msk.f32.mxu0 %vm94_vm0, %v82_v8  ;;  %518 = vmatpush3.msra.mxu1 %v90_v7  ;;  %v341_v18 = vrot.slane %v336_v16, %v340_v17 }
  0x3c   :  { %519 = vmatprep.mubr.msk.f32.mxu1 %vm94_vm0, %v84_v9  ;;  %509 = vmatmul.mubr.msk.f32.vlgmr.msra.gmra.mxu0 %vm94_vm0, %v83_v10  ;;  %p640_p10 = pnand %p639_p9, %p633_p6 }
  0x3d   :  { %520 = vmatmul.mubr.msk.f32.vlgmr.msra.gmra.mxu1 %vm94_vm0, %v85_v11  ;;  %522 = vmatprep.subr.mxu0 %v93_v1 }
  0x3e   :  { %533 = vmatprep.subr.mxu1 %v89_v0  ;;  %523 = vmatpush3.msra.mxu0 %v93_v1 }
  0x3f   :  { %534 = vmatpush3.msra.mxu1 %v89_v0  ;;  %524 = vmatprep.subr.mxu0 %v92_v3 }
  0x40   :  { %535 = vmatprep.subr.mxu1 %v88_v2  ;;  %525 = vmatpush3.msra.mxu0 %v92_v3 }
  0x41   :  { %536 = vmatpush3.msra.mxu1 %v88_v2  ;;  %526 = vmatprep.subr.mxu0 %v91_v5 }
  0x42   :  { %537 = vmatprep.subr.mxu1 %v87_v4  ;;  %527 = vmatpush3.msra.mxu0 %v91_v5 }
  0x43   :  { %538 = vmatpush3.msra.mxu1 %v87_v4  ;;  %528 = vmatprep.subr.mxu0 %v90_v7 }
  0x44   :  { %539 = vmatprep.subr.mxu1 %v86_v6  ;;  %529 = vmatpush3.msra.mxu0 %v90_v7 }
  0x45   :  { %530 = vmatprep.mubr.msk.f32.mxu0 %vm94_vm0, %v82_v8  ;;  %540 = vmatpush3.msra.mxu1 %v86_v6 }
  0x46   :  { %541 = vmatprep.mubr.msk.f32.mxu1 %vm94_vm0, %v84_v9  ;;  %531 = vmatmul.mubr.msk.f32.vlgmr.msra.gmra.mxu0 %vm94_vm0, %v83_v10 }
  0x47   :  { %542 = vmatmul.mubr.msk.f32.vlgmr.msra.gmra.mxu1 %vm94_vm0, %v85_v11 }
  0xfc   :  { %v510_v19 = vpop.f32.mrf.mxu0 }
  0xfd   :  { %v521_v20 = vpop.f32.mrf.mxu1 }
  0xfe   :  { %v335_v21 = vsub.f32 %v510_v19, %v521_v20  ;;  %v167_v22 = vpop.f32.mrf.mxu0 }
  0xff   :  { %v248_v23 = vpop.f32.mrf.mxu1 }
 0x100   :  { %v344_v24 = vadd.f32 %v341_v18, %v335_v21  ;;  %v334_v25 = vsub.f32 %v167_v22, %v248_v23 }
 0x102   :  { %346 = vst.msk [vmem:[#allocation10 + $0x8] sm:$0xff] %vm94_vm0, %v344_v24  ;;  %v343_v26 = vadd.f32 %v341_v18, %v334_v25 }
 0x104   :  { %345 = vst.msk [vmem:[#allocation10] sm:$0xff] %vm94_vm0, %v343_v26 }
 0x105   :  { %643 = shalt.err (!%p640_p10)
}
 0x106   :  { %444 = dma.vmem_to_hbm [thread:$0]  %s439_s24, 256, %s790_s6, [#allocation4], %s684_s29, %s684_s29, %s685_s30   ;;  %v427_v28 = vrot.slane %v422_v27, %v340_v17  ;;  %v532_v29 = vpop.f32.mrf.mxu0 }
 0x107   :  { %v543_v30 = vpop.f32.mrf.mxu1  ;;  %s689_s26 = smov [#allocation11]  }
 0x108   :  { %v419_v31 = vadd.f32 %v543_v30, %v532_v29  ;;  %v323_v32 = vpop.f32.mrf.mxu0  ;;  %s450_s27 = sshll.u32 %s689_s26, 4  ;;  %s451_s27 = int_to_ptr.vmem [resolvable:$true] %s450_s27 }
 0x109   :  { %v413_v33 = vpop.f32.mrf.mxu1  ;;  %s652_s28 = scalar_lea.vmem %s451_s27, 256  ;;  %p657_p12 = scmp.lt.s32.totalorder %s451_s27, %s451_s27 }
 0x10a   :  { %v430_v34 = vadd.f32 %v427_v28, %v419_v31  ;;  %v414_v35 = vadd.f32 %v413_v33, %v323_v32  ;;  %p653_p11 = scmp.ne.s32.totalorder %s451_s27, %s652_s28  ;;  %p658_p13 = scmp.lt.s32.totalorder %s652_s28, %s652_s28 }
 0x10c   :  { %432 = vst.msk [vmem:[#allocation11 + $0x8] sm:$0xff] %vm94_vm0, %v430_v34  ;;  %v429_v36 = vadd.f32 %v427_v28, %v414_v35  ;;  %p659_p0 = por %p658_p13, %p657_p12 }
 0x10e   :  { %431 = vst.msk [vmem:[#allocation11] sm:$0xff] %vm94_vm0, %v429_v36  ;;  %p660_p1 = pnand %p659_p0, %p653_p11 }
 0x110   :  { %663 = shalt.err (!%p660_p1)
}
 0x111   :  { %456 = dma.vmem_to_hbm [thread:$0]  %s451_s27, 256, %s791_s7, [#allocation12], %s684_s29, %s684_s29, %s685_s30  }
 0x112   :  { %678 = dma.done.wait [#allocation4], 256  }
 0x113   :  { %679 = vsyncadd [#allocation4], 4294967040 }
 0x114   :  { %680 = dma.done.wait [#allocation12], 256  }
 0x115   :  { %681 = vsyncadd [#allocation12], 4294967040 }
 0x116   :  { %463 = vsyncpa [#allocation3], 1 }
 0x117   :  { %464 = vsyncpa [#allocation6], 1 }
 0x118   :  { %465 = vsyncpa [#allocation9], 1 }
 0x119   :  { %466 = vsyncpa [#allocation4], 1 }
 0x11a   :  { %467 = vsyncpa [#allocation12], 1 }

</bundles_post_ra>
